<compile_context>
chip_gen: v5e
topology: v5e:2x2
jax: 0.10.0
libtpu: 0.0.40
codegen_flags: <defaults>
</compile_context>

<pallas_src>
import jax
import jax.numpy as jnp
from jax.experimental import pallas as pl
from jax.experimental.pallas import tpu as pltpu


def _round_up(x: int, m: int) -> int:
    return ((x + m - 1) // m) * m


def _cdiv(a: int, b: int) -> int:
    return (a + b - 1) // b


# --------------------------------------------------------------------------- #
# Kernel
# --------------------------------------------------------------------------- #
def _equine_kernel(x_ref, w_emb_ref, b_emb_ref, w_head_ref, b_head_ref,
                   protos_t_ref, neg_p_sq_ref, out_ref):
    # x_ref:        [TB, Fp]   bf16 batch tile (pipelined over the grid)
    # w_emb_ref:    [Fp, Hp]   bf16 (VMEM-resident, single-buffered)
    # b_emb_ref:    [1, Hp]    f32
    # w_head_ref:   [Hp, Hp]   bf16 (VMEM-resident, single-buffered)
    # b_head_ref:   [1, Hp]    f32
    # protos_t_ref: [Hp, Cp]   bf16 prototypes^T (lane-padded)
    # neg_p_sq_ref: [1, Cp]    f32  -(||p||^2) of the bf16-rounded prototypes
    # out_ref:      [TB, Cp]   f32 logits (lane-dense, unmasked store)
    x = x_ref[...]

    # embedding model: Linear + ReLU  (bf16 MXU matmul, f32 epilogue on VPU)
    emb = jnp.dot(x, w_emb_ref[...], preferred_element_type=jnp.float32)
    emb = jnp.maximum(emb + b_emb_ref[...], 0.0)

    # head: single linear layer (head_layers = 1)
    h = jnp.dot(emb.astype(w_head_ref.dtype), w_head_ref[...],
                preferred_element_type=jnp.float32)
    h = h + b_head_ref[...]                                        # f32 [TB, Hp]

    # logits = -||h - p||^2 = 2 h.p - ||p||^2 - ||h||^2
    # Round h to bf16 ONCE and use that rounding consistently for both the
    # cross term and ||h||^2; ||p||^2 was precomputed from the bf16 prototypes.
    h_b = h.astype(protos_t_ref.dtype)                             # bf16 [TB, Hp]
    h_f = h_b.astype(jnp.float32)
    cross = jnp.dot(h_b, protos_t_ref[...],
                    preferred_element_type=jnp.float32)            # [TB, Cp]
    h_sq = jnp.sum(h_f * h_f, axis=-1, keepdims=True)              # [TB, 1]
    # Clamp to <= 0: a true squared distance is non-negative.
    out_ref[...] = jnp.minimum(2.0 * cross + neg_p_sq_ref[...] - h_sq, 0.0)


# --------------------------------------------------------------------------- #
# One-time host-side parameter prep (hoisted out of the forward hot path)
# --------------------------------------------------------------------------- #
def prepare_equine_params(w_emb, b_emb, w_head, b_head, prototypes):
    """Cast / pad / transpose the weights once; reuse across forward calls."""
    F, H = w_emb.shape
    C = prototypes.shape[0]
    F_pad = _round_up(max(F, 128), 128)
    H_pad = _round_up(max(H, 128), 128)
    C_pad = _round_up(max(C, 128), 128)

    w_emb_p = jnp.pad(w_emb.astype(jnp.bfloat16),
                      ((0, F_pad - F), (0, H_pad - H)))
    w_head_p = jnp.pad(w_head.astype(jnp.bfloat16),
                       ((0, H_pad - H), (0, H_pad - H)))
    b_emb_p = jnp.pad(b_emb.astype(jnp.float32).reshape(1, H),
                      ((0, 0), (0, H_pad - H)))
    b_head_p = jnp.pad(b_head.astype(jnp.float32).reshape(1, H),
                       ((0, 0), (0, H_pad - H)))

    # bf16-round the prototypes first so ||p||^2 matches the bf16 cross term.
    protos_b = prototypes.astype(jnp.bfloat16)                      # [C, H]
    protos_t = jnp.pad(protos_b.T, ((0, H_pad - H), (0, C_pad - C)))  # [Hp, Cp]
    p_f = protos_b.astype(jnp.float32)
    neg_p_sq = -jnp.sum(p_f * p_f, axis=1)                          # [C]
    neg_p_sq = jnp.pad(neg_p_sq, (0, C_pad - C)).reshape(1, C_pad)  # [1, Cp]

    return {
        "w_emb": w_emb_p, "b_emb": b_emb_p,
        "w_head": w_head_p, "b_head": b_head_p,
        "protos_t": protos_t, "neg_p_sq": neg_p_sq,
        "F": F, "H": H, "C": C,
        "F_pad": F_pad, "H_pad": H_pad, "C_pad": C_pad,
    }


def _choose_batch_tile(B: int, block_b: int):
    """TB multiple of 16 (bf16 sublane packing), minimal tail padding, and at
    least 2 grid steps when the batch is big enough (v7x megacore sharding)."""
    block_b = max(16, _round_up(block_b, 16))
    steps = max(_cdiv(B, block_b), 1)
    if steps < 2 and B >= 32:          # each TC still gets a full 16-row pack
        steps = 2
    TB = min(_round_up(_cdiv(B, steps), 16), block_b)
    B_pad = _round_up(B, TB)
    return TB, B_pad


# --------------------------------------------------------------------------- #
# Forward
# --------------------------------------------------------------------------- #
def equine_forward_prepared(x, params, *, block_b=256):
    """x: [B, F] -> logits [B, C] (negative squared distances to prototypes)."""
    B, F = x.shape
    assert F == params["F"]
    F_pad, H_pad, C_pad = params["F_pad"], params["H_pad"], params["C_pad"]
    C = params["C"]

    TB, B_pad = _choose_batch_tile(B, block_b)
    num_steps = B_pad // TB

    x_p = jnp.pad(x.astype(jnp.bfloat16), ((0, B_pad - B), (0, F_pad - F)))

    const = lambda i: (0, 0)          # weights / biases / protos stay resident
    resident = pl.Buffered(1)         # single-buffered: block never changes

    # Shape-derived VMEM budget (single-buffered weights, double-buffered x/out,
    # f32 intermediates) with 2x headroom; keep a cap compatible with v7x/v6e.
    vmem_need = (
        (F_pad * H_pad + H_pad * H_pad + H_pad * C_pad) * 2    # bf16 weights x1
        + (2 * H_pad + C_pad) * 4                              # biases, -||p||^2
        + 2 * TB * F_pad * 2                                   # x tile x2
        + 2 * TB * C_pad * 4                                   # out tile x2
        + 4 * TB * H_pad * 4                                   # emb/h f32 temps
    )
    vmem_limit = int(min(max(2 * vmem_need, 32 << 20), 96 << 20))

    flops = 2 * B_pad * (F_pad * H_pad + H_pad * H_pad + H_pad * C_pad)
    bytes_accessed = (
        B_pad * F_pad * 2
        + (F_pad * H_pad + H_pad * H_pad + H_pad * C_pad) * 2
        + (2 * H_pad + C_pad) * 4
        + B_pad * C_pad * 4
    )

    out = pl.pallas_call(
        _equine_kernel,
        out_shape=jax.ShapeDtypeStruct((B_pad, C_pad), jnp.float32),
        grid=(num_steps,),
        in_specs=[
            pl.BlockSpec((TB, F_pad), lambda i: (i, 0)),            # X (pipelined)
            pl.BlockSpec((F_pad, H_pad), const, pipeline_mode=resident),
            pl.BlockSpec((1, H_pad), const, pipeline_mode=resident),
            pl.BlockSpec((H_pad, H_pad), const, pipeline_mode=resident),
            pl.BlockSpec((1, H_pad), const, pipeline_mode=resident),
            pl.BlockSpec((H_pad, C_pad), const, pipeline_mode=resident),
            pl.BlockSpec((1, C_pad), const, pipeline_mode=resident),
        ],
        out_specs=pl.BlockSpec((TB, C_pad), lambda i: (i, 0)),
        compiler_params=pltpu.CompilerParams(
            dimension_semantics=("parallel",),       # megacore on v7x
            vmem_limit_bytes=vmem_limit,
        ),
        cost_estimate=pl.CostEstimate(
            flops=flops, transcendentals=0, bytes_accessed=bytes_accessed),
    )(x_p, params["w_emb"], params["b_emb"], params["w_head"],
      params["b_head"], params["protos_t"], params["neg_p_sq"])

    return out[:B, :C]


def equine_forward(x, w_emb, b_emb, w_head, b_head, prototypes, *, block_b=256):
    """Convenience wrapper (prep + forward).  For repeated calls, call
    prepare_equine_params() once and reuse it with equine_forward_prepared()."""
    params = prepare_equine_params(w_emb, b_emb, w_head, b_head, prototypes)
    return equine_forward_prepared(x, params, block_b=block_b)


# --------------------------------------------------------------------------- #
# Reference + self-test
# --------------------------------------------------------------------------- #
def _reference_forward(x, w_emb, b_emb, w_head, b_head, prototypes):
    emb = jnp.maximum(x @ w_emb + b_emb[None, :], 0.0)
    h = emb @ w_head + b_head[None, :]
    d = jnp.sum((h[:, None, :] - prototypes[None, :, :]) ** 2, axis=-1)
    return -d


if __name__ == "__main__":
    # Small shapes: batch=48, features=32, hidden=32, classes=4.
    # block_b=16 -> TB=16, grid of 3 steps to exercise the pipelined batch axis.
    B, F, H, C = 48, 32, 32, 4

    key = jax.random.PRNGKey(0)
    k_x, k_we, k_be, k_wh, k_bh, k_p = jax.random.split(key, 6)

    x = jax.random.normal(k_x, (B, F), dtype=jnp.float32)
    w_emb = jax.random.normal(k_we, (F, H), dtype=jnp.float32) * 0.1
    b_emb = jax.random.normal(k_be, (H,), dtype=jnp.float32) * 0.01
    w_head = jax.random.normal(k_wh, (H, H), dtype=jnp.float32) * 0.1
    b_head = jax.random.normal(k_bh, (H,), dtype=jnp.float32) * 0.01
    prototypes = jax.random.normal(k_p, (C, H), dtype=jnp.float32)

    params = prepare_equine_params(w_emb, b_emb, w_head, b_head, prototypes)
    out = equine_forward_prepared(x, params, block_b=16)
    out = jax.block_until_ready(out)

    ref = _reference_forward(x, w_emb, b_emb, w_head, b_head, prototypes)
    assert out.shape == (B, C)
    # bf16 MXU operands (f32 accumulation) -> slightly looser tolerance.
    assert jnp.allclose(out, ref, atol=5e-2, rtol=3e-2), "mismatch vs reference"

    print("KERNEL_OK")
</pallas_src>

<mosaic_0001>
module attributes {stable_mosaic.version = 11 : i64} {
  func.func @_equine_kernel(%arg0: i32, %arg1: memref<16x128xbf16, #tpu.memory_space<vmem>>, %arg2: memref<128x128xbf16, #tpu.memory_space<vmem>>, %arg3: memref<1x128xf32, #tpu.memory_space<vmem>>, %arg4: memref<128x128xbf16, #tpu.memory_space<vmem>>, %arg5: memref<1x128xf32, #tpu.memory_space<vmem>>, %arg6: memref<128x128xbf16, #tpu.memory_space<vmem>>, %arg7: memref<1x128xf32, #tpu.memory_space<vmem>>, %arg8: memref<16x128xf32, #tpu.memory_space<vmem>>) attributes {dimension_semantics = [#tpu.dimension_semantics<parallel>], iteration_bounds = array<i64: 3>, scalar_prefetch = 0 : i64, scratch_operands = 0 : i64, tpu.core_type = #tpu.core_type<tc>, window_params = [{transform_indices = @transform_0, window_bounds = array<i64: 16, 128>}, {pipeline_mode = #tpu.pipeline_mode<synchronous>, transform_indices = @transform_1, window_bounds = array<i64: 128, 128>}, {pipeline_mode = #tpu.pipeline_mode<synchronous>, transform_indices = @transform_2, window_bounds = array<i64: 1, 128>}, {pipeline_mode = #tpu.pipeline_mode<synchronous>, transform_indices = @transform_3, window_bounds = array<i64: 128, 128>}, {pipeline_mode = #tpu.pipeline_mode<synchronous>, transform_indices = @transform_4, window_bounds = array<i64: 1, 128>}, {pipeline_mode = #tpu.pipeline_mode<synchronous>, transform_indices = @transform_5, window_bounds = array<i64: 128, 128>}, {pipeline_mode = #tpu.pipeline_mode<synchronous>, transform_indices = @transform_6, window_bounds = array<i64: 1, 128>}, {transform_indices = @transform_7, window_bounds = array<i64: 16, 128>}]} {
    %c0 = arith.constant 0 : index
    %c0_0 = arith.constant 0 : index
    %0 = vector.load %arg1[%c0, %c0_0] : memref<16x128xbf16, #tpu.memory_space<vmem>>, vector<16x128xbf16>
    %c0_1 = arith.constant 0 : index
    %c0_2 = arith.constant 0 : index
    %1 = vector.load %arg2[%c0_1, %c0_2] : memref<128x128xbf16, #tpu.memory_space<vmem>>, vector<128x128xbf16>
    %cst = arith.constant dense<0.000000e+00> : vector<16x128xf32>
    %2 = tpu.matmul %0, %1, %cst {dimension_numbers = #tpu.dot_dimension_numbers<[1], [0], [0], [1], [0, 0, 1, 1], [], []>} : vector<16x128xbf16>, vector<128x128xbf16>, vector<16x128xf32> -> vector<16x128xf32>
    %c0_3 = arith.constant 0 : index
    %c0_4 = arith.constant 0 : index
    %3 = vector.load %arg3[%c0_3, %c0_4] : memref<1x128xf32, #tpu.memory_space<vmem>>, vector<1x128xf32>
    %4 = vector.broadcast %3 : vector<1x128xf32> to vector<16x128xf32>
    %5 = arith.addf %2, %4 : vector<16x128xf32>
    %cst_5 = arith.constant 0.000000e+00 : f32
    %6 = vector.broadcast %cst_5 : f32 to vector<16x128xf32>
    %7 = arith.maximumf %5, %6 : vector<16x128xf32>
    %8 = arith.truncf %7 : vector<16x128xf32> to vector<16x128xbf16>
    %c0_6 = arith.constant 0 : index
    %c0_7 = arith.constant 0 : index
    %9 = vector.load %arg4[%c0_6, %c0_7] : memref<128x128xbf16, #tpu.memory_space<vmem>>, vector<128x128xbf16>
    %cst_8 = arith.constant dense<0.000000e+00> : vector<16x128xf32>
    %10 = tpu.matmul %8, %9, %cst_8 {dimension_numbers = #tpu.dot_dimension_numbers<[1], [0], [0], [1], [0, 0, 1, 1], [], []>} : vector<16x128xbf16>, vector<128x128xbf16>, vector<16x128xf32> -> vector<16x128xf32>
    %c0_9 = arith.constant 0 : index
    %c0_10 = arith.constant 0 : index
    %11 = vector.load %arg5[%c0_9, %c0_10] : memref<1x128xf32, #tpu.memory_space<vmem>>, vector<1x128xf32>
    %12 = vector.broadcast %11 : vector<1x128xf32> to vector<16x128xf32>
    %13 = arith.addf %10, %12 : vector<16x128xf32>
    %14 = arith.truncf %13 : vector<16x128xf32> to vector<16x128xbf16>
    %15 = arith.extf %14 : vector<16x128xbf16> to vector<16x128xf32>
    %c0_11 = arith.constant 0 : index
    %c0_12 = arith.constant 0 : index
    %16 = vector.load %arg6[%c0_11, %c0_12] : memref<128x128xbf16, #tpu.memory_space<vmem>>, vector<128x128xbf16>
    %cst_13 = arith.constant dense<0.000000e+00> : vector<16x128xf32>
    %17 = tpu.matmul %14, %16, %cst_13 {dimension_numbers = #tpu.dot_dimension_numbers<[1], [0], [0], [1], [0, 0, 1, 1], [], []>} : vector<16x128xbf16>, vector<128x128xbf16>, vector<16x128xf32> -> vector<16x128xf32>
    %18 = arith.mulf %15, %15 : vector<16x128xf32>
    %cst_14 = arith.constant dense<0.000000e+00> : vector<16xf32>
    %19 = vector.multi_reduction <add>, %18, %cst_14 [1] : vector<16x128xf32> to vector<16xf32>
    %20 = vector.shape_cast %19 : vector<16xf32> to vector<16x1xf32>
    %cst_15 = arith.constant 2.000000e+00 : f32
    %21 = vector.broadcast %cst_15 : f32 to vector<16x128xf32>
    %22 = arith.mulf %21, %17 : vector<16x128xf32>
    %c0_16 = arith.constant 0 : index
    %c0_17 = arith.constant 0 : index
    %23 = vector.load %arg7[%c0_16, %c0_17] : memref<1x128xf32, #tpu.memory_space<vmem>>, vector<1x128xf32>
    %24 = vector.broadcast %23 : vector<1x128xf32> to vector<16x128xf32>
    %25 = arith.addf %22, %24 : vector<16x128xf32>
    %26 = vector.broadcast %20 : vector<16x1xf32> to vector<16x128xf32>
    %27 = arith.subf %25, %26 : vector<16x128xf32>
    %cst_18 = arith.constant 0.000000e+00 : f32
    %28 = vector.broadcast %cst_18 : f32 to vector<16x128xf32>
    %29 = arith.minimumf %27, %28 : vector<16x128xf32>
    %c0_19 = arith.constant 0 : index
    %c0_20 = arith.constant 0 : index
    %30 = vector.load %arg8[%c0_19, %c0_20] : memref<16x128xf32, #tpu.memory_space<vmem>>, vector<16x128xf32>
    tpu.vector_store %arg8[%c0_19, %c0_20], %29 {strides = array<i32>} : memref<16x128xf32, #tpu.memory_space<vmem>>, vector<16x128xf32>,
    return
  }
  func.func @transform_0(%arg0: i32) -> (i32, i32) {
    %c0_i32 = arith.constant 0 : i32
    %c0_i32_0 = arith.constant 0 : i32
    return %arg0, %c0_i32 : i32, i32
  }
  func.func @transform_1(%arg0: i32) -> (i32, i32) {
    %c0_i32 = arith.constant 0 : i32
    %c0_i32_0 = arith.constant 0 : i32
    %c0_i32_1 = arith.constant 0 : i32
    return %c0_i32, %c0_i32_0 : i32, i32
  }
  func.func @transform_2(%arg0: i32) -> (i32, i32) {
    %c0_i32 = arith.constant 0 : i32
    %c0_i32_0 = arith.constant 0 : i32
    %c0_i32_1 = arith.constant 0 : i32
    return %c0_i32, %c0_i32_0 : i32, i32
  }
  func.func @transform_3(%arg0: i32) -> (i32, i32) {
    %c0_i32 = arith.constant 0 : i32
    %c0_i32_0 = arith.constant 0 : i32
    %c0_i32_1 = arith.constant 0 : i32
    return %c0_i32, %c0_i32_0 : i32, i32
  }
  func.func @transform_4(%arg0: i32) -> (i32, i32) {
    %c0_i32 = arith.constant 0 : i32
    %c0_i32_0 = arith.constant 0 : i32
    %c0_i32_1 = arith.constant 0 : i32
    return %c0_i32, %c0_i32_0 : i32, i32
  }
  func.func @transform_5(%arg0: i32) -> (i32, i32) {
    %c0_i32 = arith.constant 0 : i32
    %c0_i32_0 = arith.constant 0 : i32
    %c0_i32_1 = arith.constant 0 : i32
    return %c0_i32, %c0_i32_0 : i32, i32
  }
  func.func @transform_6(%arg0: i32) -> (i32, i32) {
    %c0_i32 = arith.constant 0 : i32
    %c0_i32_0 = arith.constant 0 : i32
    %c0_i32_1 = arith.constant 0 : i32
    return %c0_i32, %c0_i32_0 : i32, i32
  }
  func.func @transform_7(%arg0: i32) -> (i32, i32) {
    %c0_i32 = arith.constant 0 : i32
    %c0_i32_0 = arith.constant 0 : i32
    return %arg0, %c0_i32 : i32, i32
  }
}

</mosaic_0001>

<bundles_post_ra>
// kernel: tpu_custom_call.1
= control target key start
LH: loop header
LB: loop body
LE: loop exit
PB: predicated region body
PF: predicated region fallthrough
CT: control target
= control target key end

     0   :  { %s1404_s0 = inlined_call_operand.hbm [shape: bf16[48,128], index: 0, kind: input, shape index: {}]   ;;  %s1405_s1 = inlined_call_operand.hbm [shape: bf16[128,128], index: 1, kind: input, shape index: {}]   ;;  %s1406_s2 = inlined_call_operand.vmem [shape: f32[1,128], index: 2, kind: input, shape index: {}]   ;;  %s1407_s3 = inlined_call_operand.hbm [shape: bf16[128,128], index: 3, kind: input, shape index: {}]   ;;  %s1408_s4 = inlined_call_operand.vmem [shape: f32[1,128], index: 4, kind: input, shape index: {}]   ;;  %s1409_s5 = inlined_call_operand.hbm [shape: bf16[128,128], index: 5, kind: input, shape index: {}]   ;;  %s1410_s6 = inlined_call_operand.vmem [shape: f32[1,128], index: 6, kind: input, shape index: {}]   ;;  %s1411_s7 = inlined_call_operand.hbm [shape: f32[48,128], index: 7, kind: output, shape index: {}]  }
   0x1   :  { %1414 = sst [smem:[#allocation15_spill]] %s1405_s1 }
   0x2   :  { %12 = vsyncpa [#allocation3], 0 }
   0x3   :  { %14 = vsyncpa [#allocation3 + $0x1], 0 }
   0x4   :  { %15 = vsyncpa [#allocation6], 0 }
   0x5   :  { %16 = vsyncpa [#allocation9], 0 }
   0x6   :  { %17 = vsyncpa [#allocation4], 0 }
   0x7   :  { %19 = vsyncpa [#allocation4 + $0x1], 0  ;;  %s1226_s24 = smov 0   ;;  %s1228_s25 = smov 0  }
   0x8   :  { %s1230_s26 = smov 0   ;;  %s1232_s27 = smov 0  }
   0x9 LB: > { %s1247_s28 = sadd.s32 4294967295, %s1177_s27   ;;  %s752_s29 = sadd.s32 4294967294, %s1177_s27   ;;  %s1177_s27 = sphi %s1232_s27, %s1427_s27   ;;  %s1173_s26 = sphi %s1230_s26, %s1426_s26   ;;  %s1169_s25 = sphi %s1228_s25, %s1425_s25   ;;  %s1165_s24 = sphi %s1226_s24, %s1424_s24  }
   0xa   : > { %p45_p0 = scmp.ne.s32.totalorder %s1169_s25, %s1165_s24  ;;  %p46_p1 = scmp.eq.s32.totalorder %s1247_s28, 0 }
   0xb   : > { %p195_p2 = scmp.eq.s32.totalorder %s1247_s28, 2  ;;  %p201_p3 = scmp.eq.s32.totalorder %s752_s29, 2 }
   0xc   : > { %p1256_p4 = por %p46_p1, %p45_p0  ;;  %p753_p5 = scmp.ge.s32.totalorder %s1177_s27, 1 }
   0xd   : > { %p1261_p6 = por %p201_p3, %p45_p0  ;;  %p208_p7 = scmp.lt.s32.totalorder %s1177_s27, 4 }
   0xe   : > { %s1417_s1 = sld [smem:[#allocation15_spill]]  ;;  %s1179_s13 = smov [#allocation5]  }
   0xf   : > { %p1269_p8 = pnand %p753_p5, %p208_p7  ;;  %s221_s14 = sshll.u32 %s1179_s13, 4  ;;  %s222_s14 = int_to_ptr.vmem [resolvable:$true] %s221_s14 }
  0x10   : > { %s236_s18 = sshll.u32 %s1407_s3, 4  ;;  %s1412_s19 = smov 64   ;;  %s237_s18 = int_to_ptr.hbm [resolvable:$true] %s236_s18 }
  0x11   : > { %p915_p9 = pneg %p1269_p8  ;;  %s1413_s20 = smov 4  }
  0x12   : > { %s1182_s21 = smov [#allocation7]   ;;  %s253_s9 = sshll.u32 %s1409_s5, 4  ;;  %s254_s9 = int_to_ptr.hbm [resolvable:$true] %s253_s9 }
  0x13   : > { %p1277_p10 = pnand %p915_p9, %p46_p1  ;;  %s238_s22 = sshll.u32 %s1182_s21, 4  ;;  %s239_s22 = int_to_ptr.vmem [resolvable:$true] %s238_s22 }
  0x14   : > { %s219_s11 = sshll.u32 %s1417_s1, 4  ;;  %s1183_s10 = smov [#allocation8]   ;;  %s220_s11 = int_to_ptr.hbm [resolvable:$true] %s219_s11 }
  0x15   : > { %918 = dma.hbm_to_vmem [thread:$0]  (!%p1277_p10), %s220_s11, 1024, %s222_s14, [#allocation6], %s1412_s19, %s1412_s19, %s1413_s20  }
  0x16   : > { %921 = dma.hbm_to_vmem [thread:$0]  (!%p1277_p10), %s237_s18, 1024, %s239_s22, [#allocation6], %s1412_s19, %s1412_s19, %s1413_s20  }
  0x17   : > { %s255_s11 = sshll.u32 %s1183_s10, 4  ;;  %s1298_s13 = sadd.s32 1, %s1177_s27   ;;  %s256_s11 = int_to_ptr.vmem [resolvable:$true] %s255_s11 }
  0x18   : > { %924 = dma.hbm_to_vmem [thread:$0]  (!%p1277_p10), %s254_s9, 1024, %s256_s11, [#allocation9], %s1412_s19, %s1412_s19, %s1413_s20  }
  0x19   : > { %s29_s14 = ssub.s32 %s1177_s27, %s1298_s13  ;;  %s32_s16 = sadd.s32 1, %s1173_s26 }
  0x1a   : > { %p30_p11 = scmp.eq.s32.totalorder %s29_s14, 0  ;;  %p39_p12 = scmp.ne.s32.totalorder %s1173_s26, %s1169_s25 }
  0x1b   : > { %p40_p13 = scmp.eq.s32.totalorder %s1177_s27, 0  ;;  %p936_p3 = scmp.lt.s32.totalorder %s1177_s27, 3 }
  0x1c   : > { %s1312_s17 = scalar_select %p30_p11, %s1173_s26, %s32_s16  }
  0x1d   : > { %p1316_p0 = por %p195_p2, %p39_p12  ;;  %s272_s21 = sand.u32 1, %s1173_s26  }
  0x1e   : > { %s872_s15 = sshll.u32 %s1177_s27, 3  ;;  %p41_p5 = por %p40_p13, %p39_p12 }
  0x1f   : > { %s758_s22 = sshll.u32 %s272_s21, 3  ;;  %s281_s9 = scalar_lea.hbm %s1404_s0, %s872_s15 }
  0x20   : > { %s282_s10 = sshll.u32 %s281_s9, 4  ;;  %s276_s11 = scalar_lea.vmem [#allocation2], %s758_s22  ;;  %s283_s10 = int_to_ptr.hbm [resolvable:$true] %s282_s10 }
  0x21   : > { %s284_s14 = sshll.u32 %s276_s11, 4  ;;  %p1326_p7 = pnand %p936_p3, %p41_p5  ;;  %s285_s14 = int_to_ptr.vmem [resolvable:$true] %s284_s14 }
  0x22   : > { %s273_s19 = scalar_lea.sflag [#allocation3], %s272_s21  ;;  %s1073_s20 = sshra.s32 %s283_s10, 4  ;;  %s1074_s20 = int_to_ptr.hbm [resolvable:$true] %s1073_s20 }
  0x23   : > { %s1075_s1 = scalar_lea.hbm %s1074_s20, 8  ;;  %p1077_p9 = pneg %p1326_p7 }
  0x24   : > { %p1076_p2 = scmp.ne.s32.totalorder %s1074_s20, %s1075_s1  ;;  %s1080_s22 = scalar_lea.hbm %s1404_s0, 24 }
  0x25   : > { %p1081_p12 = scmp.lt.s32.totalorder %s1074_s20, %s1404_s0  ;;  %p1082_p13 = scmp.lt.s32.totalorder %s1080_s22, %s1075_s1 }
  0x26   : > { %p1078_p10 = pnand %p1077_p9, %p1076_p2 }
  0x27   : > { %p1083_p3 = por %p1082_p13, %p1081_p12 }
  0x28   : > { %p1079_p11 = pneg %p1078_p10 }
  0x2a   : > { %p1084_p5 = pnand %p1083_p3, %p1079_p11 }
  0x2c   : > { %1087 = shalt.err (!%p1084_p5)
}
  0x2d   : > { %s1422_s21 = smov 4   ;;  %s1423_s11 = smov 64  }
  0x2e   : > { %928 = dma.hbm_to_vmem [thread:$0]  (!%p1326_p7), %s283_s10, 128, %s285_s14, %s273_s19, %s1423_s11, %s1423_s11, %s1422_s21  }
  0x2f   : > { %296 = sbr.rel (%p1269_p8) target bundleno = 523 (0x20b), region = 48  ;;  %s1346_s15 = sand.u32 (!%p1269_p8), 1, %s1169_s25  }
  0x30   : > { %s762_s20 = sshll.u32 (!%p1269_p8), %s1346_s15, 3  ;;  %s299_s1 = scalar_lea.sflag (!%p1269_p8), [#allocation3], %s1346_s15 }
  0x31   : > { %s302_s23 = scalar_lea.vmem (!%p1269_p8), [#allocation2], %s762_s20 }
  0x34   : > { %1148 = dma.done.wait (%p1256_p4), %s299_s1, 128  }
  0x35   : > { %1150 = vsyncadd (%p1256_p4), %s299_s1, 4294967168 }
  0x36   : > { %1152 = dma.done.wait (%p46_p1), [#allocation6], 2048  }
  0x37   : > { %1154 = vsyncadd (%p46_p1), [#allocation6], 4294965248 }
  0x38   : > { %1156 = dma.done.wait (%p46_p1), [#allocation9], 1024  }
  0x39   : > { %1158 = vsyncadd (%p46_p1), [#allocation9], 4294966272  ;;  %v881_v0 = vld [vmem:[#allocation5 + $0x38] sm:$0xff]  ;;  %v880_v1 = vld [vmem:[#allocation5 + $0x30] sm:$0xff]  ;;  %s766_s22 = sshll.u32 %s1346_s15, 4  ;;  %s898_s29 = sshll.u32 %s1247_s28, 4 }
  0x3a   : > { %427 = vmatpush.bf16.msra.mxu0 %v881_v0  ;;  %v889_v2 = vld [vmem:[#allocation7 + $0x38] sm:$0xff]  ;;  %v888_v3 = vld [vmem:[#allocation7 + $0x30] sm:$0xff]  ;;  %v879_v4 = vld [vmem:[#allocation5 + $0x28] sm:$0xff]  ;;  %s646_s11 = scalar_lea.hbm %s1411_s7, %s898_s29  ;;  %s348_s20 = scalar_lea.vmem [#allocation10], %s766_s22 }
  0x3b   : > { %512 = vmatpush.bf16.msra.mxu1 %v889_v2  ;;  %v887_v5 = vld [vmem:[#allocation7 + $0x28] sm:$0xff]  ;;  %v878_v6 = vld [vmem:[#allocation5 + $0x20] sm:$0xff]  ;;  %v877_v8 = vld [vmem:[#allocation5 + $0x18] sm:$0xff]  ;;  %s647_s1 = sshll.u32 %s348_s20, 4  ;;  %s635_s28 = scalar_lea.sflag [#allocation4], %s1346_s15  ;;  %s648_s1 = int_to_ptr.vmem [resolvable:$true] %s647_s1 }
  0x3c   : > { %v886_v7 = vld [vmem:[#allocation7 + $0x20] sm:$0xff]  ;;  %v876_v9 = vld [vmem:[#allocation5 + $0x10] sm:$0xff]  ;;  %v875_v10 = vld [vmem:[#allocation5 + $0x8] sm:$0xff]  ;;  %s1123_s14 = scalar_lea.hbm %s1411_s7, 48 }
  0x3d   : > { %v874_v11 = vld [vmem:[#allocation5] sm:$0xff]  ;;  %v873_v12 = vld [vmem:[%s302_s23] sm:$0xff]  ;;  %v883_v15 = vld [vmem:[#allocation7 + $0x8] sm:$0xff]  ;;  %s649_s23 = sshll.u32 %s646_s11, 4  ;;  %s650_s23 = int_to_ptr.hbm [resolvable:$true] %s649_s23 }
  0x3e   : > { %428 = vmatpush.bf16.msra.mxu0 %v880_v1  ;;  %v885_v13 = vld [vmem:[#allocation7 + $0x18] sm:$0xff]  ;;  %v884_v14 = vld [vmem:[#allocation7 + $0x10] sm:$0xff]  ;;  %v882_v16 = vld [vmem:[#allocation7] sm:$0xff]  ;;  %s1117_s30 = sshra.s32 %s650_s23, 4  ;;  %s1118_s30 = int_to_ptr.hbm [resolvable:$true] %s1117_s30 }
  0x3f   : > { %513 = vmatpush.bf16.msra.mxu1 %v888_v3  ;;  %v897_v17 = vld [vmem:[#allocation8 + $0x38] sm:$0xff]  ;;  %v896_v18 = vld [vmem:[#allocation8 + $0x30] sm:$0xff]  ;;  %v895_v19 = vld [vmem:[#allocation8 + $0x28] sm:$0xff]  ;;  %s1119_s12 = scalar_lea.hbm %s1118_s30, 16  ;;  %p1124_p7 = scmp.lt.s32.totalorder %s1118_s30, %s1411_s7 }
  0x40   : > { %600 = vmatpush.bf16.msra.mxu2 %v897_v17  ;;  %v894_v20 = vld [vmem:[#allocation8 + $0x20] sm:$0xff]  ;;  %v980_v22 = vld [vmem:[%s1406_s2] ss:$0 sm:$0xff]  ;;  %v893_v29 = vld [vmem:[#allocation8 + $0x18] sm:$0xff]  ;;  %p1120_p1 = scmp.ne.s32.totalorder %s1118_s30, %s1119_s12  ;;  %p1125_p2 = scmp.lt.s32.totalorder %s1123_s14, %s1119_s12 }
  0x41   : > { %v892_v30 = vld [vmem:[#allocation8 + $0x10] sm:$0xff]  ;;  %v891_v31 = vld [vmem:[#allocation8 + $0x8] sm:$0xff]  ;;  %v890_v32 = vld [vmem:[#allocation8] sm:$0xff] }
  0x42   : > { %429 = vmatpush.bf16.msra.mxu0 %v879_v4  ;;  %v981_v33 = vld [vmem:[%s1408_s4] ss:$0 sm:$0xff]  ;;  %p1121_p4 = pnand %p1120_p1, %p1316_p0  ;;  %p1126_p9 = por %p1125_p2, %p1124_p7 }
  0x43   : > { %514 = vmatpush.bf16.msra.mxu1 %v887_v5  ;;  %v982_v47 = vld [vmem:[%s1410_s6] ss:$0 sm:$0xff] }
  0x44   : > { %601 = vmatpush.bf16.msra.mxu2 %v896_v18  ;;  %p1122_p8 = pneg %p1121_p4 }
  0x46   : > { %430 = vmatpush.bf16.msra.mxu0 %v878_v6  ;;  %p1127_p10 = pnand %p1126_p9, %p1122_p8 }
  0x47   : > { %515 = vmatpush.bf16.msra.mxu1 %v886_v7 }
  0x48   : > { %602 = vmatpush.bf16.msra.mxu2 %v895_v19 }
  0x4a   : > { %431 = vmatpush.bf16.msra.mxu0 %v877_v8 }
  0x4b   : > { %516 = vmatpush.bf16.msra.mxu1 %v885_v13 }
  0x4c   : > { %603 = vmatpush.bf16.msra.mxu2 %v894_v20 }
  0x4e   : > { %432 = vmatpush.bf16.msra.mxu0 %v876_v9 }
  0x4f   : > { %517 = vmatpush.bf16.msra.mxu1 %v884_v14 }
  0x50   : > { %604 = vmatpush.bf16.msra.mxu2 %v893_v29 }
  0x52   : > { %433 = vmatpush.bf16.msra.mxu0 %v875_v10 }
  0x53   : > { %518 = vmatpush.bf16.msra.mxu1 %v883_v15 }
  0x54   : > { %605 = vmatpush.bf16.msra.mxu2 %v892_v30 }
  0x56   : > { %434 = vmatpush.bf16.msra.mxu0 %v874_v11 }
  0x57   : > { %519 = vmatpush.bf16.msra.mxu1 %v882_v16 }
  0x58   : > { %606 = vmatpush.bf16.msra.mxu2 %v891_v31 }
  0x59   : > { %435 = vmatmul.bf16.vlgmr.msra.gmra.mxu0 %v873_v12 }
  0x5c   : > { %607 = vmatpush.bf16.msra.mxu2 %v890_v32 }
  0xd6   : > { %v436_v21 = vpop.f32.mrf.mxu0 }
  0xd7   : > { %v437_v23 = vadd.f32 %v980_v22, %v436_v21 }
  0xd9   : > { %v441_v26 = vmax.f32 %v437_v23, 0.0 }
  0xde   : > { %v438_v24 = vpop.f32.mrf.mxu0 }
  0xdf   : > { %v439_v25 = vadd.f32 %v980_v22, %v438_v24 }
  0xe1   : > { %v442_v27 = vmax.f32 %v439_v25, 0.0 }
  0xe3   : > { %v443_v28 = vpack.c.bf16 %v442_v27, %v441_v26 }
  0xe5   : > { %520 = vmatmul.bf16.vlgmr.msra.gmra.mxu1 %v443_v28 }
 0x162   : > { %v521_v34 = vpop.f32.mrf.mxu1 }
 0x163   : > { %v522_v35 = vadd.f32 %v981_v33, %v521_v34 }
 0x165   : > { %v526_v36 = vpack.c.bf16 %v522_v35, %v522_v35 }
 0x167   : > { %v528_v37 = vunpack.c.l.bf16 %v526_v36  ;;  %v548_v42 = vunpack.c.l.b16 %v526_v36 }
 0x169   : > { %v614_v38 = vmul.f32 %v528_v37, %v528_v37 }
 0x16a   : > { %v523_v39 = vpop.f32.mrf.mxu1 }
 0x16b   : > { %v524_v40 = vadd.f32 %v981_v33, %v523_v39  ;;  %616 = vadd.xlane.f32.xlu0 %v614_v38 }
 0x16d   : > { %v527_v41 = vpack.c.bf16 %v524_v40, %v524_v40 }
 0x16f   : > { %v549_v43 = vunpack.c.l.b16 %v527_v41  ;;  %v529_v44 = vunpack.c.l.bf16 %v527_v41 }
 0x171   : > { %v550_v45 = vpack.c.b16 %v549_v43, %v548_v42  ;;  %v615_v46 = vmul.f32 %v529_v44, %v529_v44 }
 0x173   : > { %608 = vmatmul.bf16.vlgmr.msra.gmra.mxu2 %v550_v45  ;;  %618 = vadd.xlane.f32.xlu0 %v615_v46 }
 0x1de   : > { %v617_v50 = vpop.xlane.xlu0 %616 }
 0x1e6   : > { %v619_v57 = vpop.xlane.xlu0 %618 }
 0x1f6   : > { %v609_v48 = vpop.f32.mrf.mxu2 }
 0x1f7   : > { %v620_v49 = vmul.f32 2.0, %v609_v48 }
 0x1f9   : > { %v626_v51 = vadd.f32 %v982_v47, %v620_v49 }
 0x1fb   : > { %v628_v52 = vsub.f32 %v626_v51, %v617_v50 }
 0x1fd   : > { %v630_v53 = vmin.f32 %v628_v52, 0.0 }
 0x1fe   : > { %v611_v54 = vpop.f32.mrf.mxu2 }
 0x1ff   : > { %632 = vst [vmem:[%s348_s20] sm:$0xff] %v630_v53  ;;  %v621_v55 = vmul.f32 2.0, %v611_v54 }
 0x201   : > { %v627_v56 = vadd.f32 %v982_v47, %v621_v55 }
 0x203   : > { %v629_v58 = vsub.f32 %v627_v56, %v619_v57 }
 0x205   : > { %v631_v59 = vmin.f32 %v629_v58, 0.0 }
 0x207   : > { %633 = vst [vmem:[%s348_s20 + $0x8] sm:$0xff] %v631_v59 }
 0x208   : > { %1130 = shalt.err (!%p1127_p10)
}
 0x209   : > { %s1184_s15 = smov 128   ;;  %s1185_s29 = smov 8  }
 0x20a   : > { %913 = dma.vmem_to_hbm [thread:$0]  (%p1316_p0), %s648_s1, 256, %s650_s23, %s635_s28, %s1184_s15, %s1184_s15, %s1185_s29  }
 0x20b PF: > { %p940_p11 = scmp.ge.s32.totalorder %s1177_s27, 2  ;;  %s664_s9 = sand.u32 1, %s1165_s24  }
 0x20c   : > { %s665_s21 = scalar_lea.sflag [#allocation4], %s664_s9 }
 0x20d   : > { %p930_p12 = pnand %p940_p11, %p1261_p6 }
 0x20f   : > { %p931_p13 = pneg %p930_p12 }
 0x211   : > { %1160 = dma.done.wait (%p931_p13), %s665_s21, 256  }
 0x212   : > { %1162 = vsyncadd (%p931_p13), %s665_s21, 4294967040  ;;  %p22_p3 = scmp.ge.s32.totalorder %s1298_s13, 5   ;;  %s1424_s24 = smov %s1169_s25 }
 0x213   : > { %s1425_s25 = smov %s1173_s26  ;;  %s1426_s26 = smov %s1312_s17 }
 0x214   : > { %s1427_s27 = smov %s1298_s13  ;;  %24 = sbr.rel (!%p22_p3) target bundleno = 9 (0x9), region = 105 }
 0x219   :  { %671 = vsyncpa [#allocation3], 1 }
 0x21a   :  { %673 = vsyncpa [#allocation3 + $0x1], 1 }
 0x21b   :  { %674 = vsyncpa [#allocation6], 1 }
 0x21c   :  { %675 = vsyncpa [#allocation9], 1 }
 0x21d   :  { %676 = vsyncpa [#allocation4], 1 }
 0x21e   :  { %678 = vsyncpa [#allocation4 + $0x1], 1 }

</bundles_post_ra>
